<compile_context>
chip_gen: v6e
topology: v6e:2x2x1
jax: 0.10.0
libtpu: 0.0.40
codegen_flags: <defaults>
</compile_context>

<pallas_src>
import math
from functools import partial

import jax
import jax.numpy as jnp
from jax import lax
from jax.experimental import pallas as pl
from jax.experimental.pallas import tpu as pltpu


def _round_up(x, m):
    return ((x + m - 1) // m) * m


# ----------------------------------------------------------------------------
# Kernel: one (tm x H) token tile; grid axis 1 sweeps F in tf-sized slabs
# (reduction axis last, "arbitrary"), accumulating into a persistent f32
# scratch so VMEM footprint is independent of F.
# ----------------------------------------------------------------------------
def _mlp_kernel(x_ref, w_in_ref, b_in_ref, w_out_ref, b_out_ref, o_ref, acc_ref,
                *, gelu_approximate):
    f = pl.program_id(1)

    @pl.when(f == 0)
    def _():
        acc_ref[...] = jnp.zeros_like(acc_ref)

    w1 = w_in_ref[...]                          # (H, tf) compute dtype (bf16)
    x = x_ref[...].astype(w1.dtype)             # (tm, H) cast hides under MXU

    # dense_in slab:  x @ W_in^T[:, f_tile]  -> (tm, tf); f32 MXU accumulation.
    h = jnp.dot(x, w1, preferred_element_type=jnp.float32)
    h = h + b_in_ref[...]                       # (1, tf) f32 broadcast

    if gelu_approximate:
        h = jax.nn.gelu(h, approximate=True)    # tanh form -> EUP slot
    else:
        # exact erf GELU == torch.nn.functional.gelu default
        h = 0.5 * h * (1.0 + lax.erf(h * 0.7071067811865476))

    # dense_out partial:  h @ W_out^T[f_tile, :]  accumulated into f32 scratch.
    w2 = w_out_ref[...]                         # (tf, H) contiguous slab
    acc_ref[...] += jnp.dot(h.astype(w2.dtype), w2,
                            preferred_element_type=jnp.float32)

    @pl.when(f == pl.num_programs(1) - 1)
    def _():
        o_ref[...] = (acc_ref[...] + b_out_ref[...]).astype(o_ref.dtype)


# ----------------------------------------------------------------------------
# Parameter preparation (do ONCE at load time, not per forward call)
# ----------------------------------------------------------------------------
def prepare_mlp_params(w_in, b_in, w_out, b_out, compute_dtype=jnp.bfloat16):
    """One-time layout + dtype prep from nn.Linear layouts.

    In:  w_in (F, H), b_in (F,), w_out (H, F), b_out (H,)
    Out: w_in_t (H, F), b_in (1, F) f32, w_out_t (F, H), b_out (1, H) f32,
         with weights in `compute_dtype` (bf16 = fast path on v5e/v6e/v7x;
         f32 is a test-only slow path).
    """
    F, H = w_in.shape
    assert w_out.shape == (H, F) and b_in.shape == (F,) and b_out.shape == (H,)
    return (jnp.asarray(w_in.T, dtype=compute_dtype),
            b_in.astype(jnp.float32).reshape(1, F),
            jnp.asarray(w_out.T, dtype=compute_dtype),
            b_out.astype(jnp.float32).reshape(1, H))


# ----------------------------------------------------------------------------
# VMEM-budget-driven tile planning
# ----------------------------------------------------------------------------
def _vmem_budget():
    try:
        cap = int(pltpu.get_tpu_info().vmem_capacity_bytes)
    except Exception:
        cap = 64 * 2**20            # v7x per-core floor: safe on all generations
    return int(0.70 * cap), cap     # leave compiler headroom


def _vmem_bytes(tm, tf, H, x_isz, w_isz, out_isz):
    est = 2 * tm * H * x_isz        # x tile (double buffered)
    est += 4 * H * tf * w_isz       # W_in^T + W_out^T slabs (double buffered)
    est += 2 * (tf + H) * 4         # biases
    est += 2 * tm * H * out_isz     # out tile (double buffered)
    est += tm * H * 4               # f32 accumulator scratch
    est += 2 * tm * tf * 4          # hidden slab + GELU temporaries headroom
    return est


def _choose_tiles(M, H, F, x_isz, w_isz, out_isz, tm_pref, tf_pref, budget):
    """Pick (tm, tf) fitting the VMEM budget.

    Prefers large tm (arithmetic intensity against re-streamed weights) but
    keeps tf >= 256 when possible; tf always divides F and is a multiple of
    128 (or == F for small/odd F)."""
    top = min(tf_pref, F)
    tf_cands = [t for t in range(top - top % 128, 127, -128) if F % t == 0]
    if not tf_cands:
        tf_cands = [F]              # no 128-multiple divisor (small F)

    m_cap = max(8, _round_up(M, 8))

    def max_tm(tf):
        fixed = 4 * H * tf * w_isz + 8 * tf + 8 * H
        per_row = 2 * H * x_isz + 2 * H * out_isz + 4 * H + 8 * tf
        avail = budget - fixed
        if avail < 8 * per_row:
            return 0
        return (avail // per_row) // 8 * 8

    chosen = None
    for tf in tf_cands:
        tm_fit = min(max_tm(tf), tm_pref, m_cap)
        if tm_fit >= min(256, m_cap):
            chosen = (tm_fit, tf)
            break
        if chosen is None or tm_fit > chosen[0]:
            chosen = (tm_fit, tf)
    tm, tf = chosen
    tm = max(8, tm)

    # v7x megacore: ensure the "parallel" M axis has >= 2 tiles when possible.
    if tm >= M > 8:
        tm = max(8, _round_up((M + 1) // 2, 8))
    return tm, tf


# ----------------------------------------------------------------------------
# Wrapper
# ----------------------------------------------------------------------------
def parallel_mlp_forward(x, w_in_t, b_in, w_out_t, b_out, *,
                         tm=1024, tf=512, gelu_approximate=False):
    """Fused MLP forward.  Params must come from `prepare_mlp_params`.

    x: [..., H]; w_in_t: [H, F]; b_in: [1, F] f32; w_out_t: [F, H]; b_out: [1, H] f32.
    """
    orig_shape = x.shape
    H, F = w_in_t.shape
    assert orig_shape[-1] == H
    assert w_out_t.shape == (F, H)
    assert b_in.shape == (1, F) and b_out.shape == (1, H)

    x2 = x.reshape(-1, H)
    M = x2.shape[0]

    x_isz = jnp.dtype(x.dtype).itemsize
    w_isz = jnp.dtype(w_in_t.dtype).itemsize
    out_isz = x_isz

    budget, cap = _vmem_budget()
    tm, tf = _choose_tiles(M, H, F, x_isz, w_isz, out_isz, tm, tf, budget)

    est = _vmem_bytes(tm, tf, H, x_isz, w_isz, out_isz)
    vmem_limit = int(min(int(0.92 * cap), max(est + (8 << 20), 32 << 20)))

    grid = (pl.cdiv(M, tm), F // tf)   # reduction (F) axis last, "arbitrary"

    kernel = partial(_mlp_kernel, gelu_approximate=gelu_approximate)

    out = pl.pallas_call(
        kernel,
        out_shape=jax.ShapeDtypeStruct((M, H), x.dtype),
        grid_spec=pltpu.PrefetchScalarGridSpec(
            num_scalar_prefetch=0,
            grid=grid,
            in_specs=[
                pl.BlockSpec((tm, H), lambda i, f: (i, 0)),   # x tile (resident over f)
                pl.BlockSpec((H, tf), lambda i, f: (0, f)),   # W_in^T  F-slab
                pl.BlockSpec((1, tf), lambda i, f: (0, f)),   # b_in    F-slab
                pl.BlockSpec((tf, H), lambda i, f: (f, 0)),   # W_out^T F-slab (contiguous)
                pl.BlockSpec((1, H), lambda i, f: (0, 0)),    # b_out
            ],
            out_specs=pl.BlockSpec((tm, H), lambda i, f: (i, 0)),
            scratch_shapes=[pltpu.VMEM((tm, H), jnp.float32)],
        ),
        compiler_params=pltpu.CompilerParams(
            dimension_semantics=("parallel", "arbitrary"),
            vmem_limit_bytes=vmem_limit,
        ),
    )(x2, w_in_t, b_in, w_out_t, b_out)

    return out.reshape(orig_shape)


# ----------------------------------------------------------------------------
# Deterministic parameter init (mirrors module __init__ shapes) + reference
# ----------------------------------------------------------------------------
def init_params(key, io_features, intermediate_feature_factor, dtype=jnp.float32):
    intermediate = int(io_features * intermediate_feature_factor)
    assert float(intermediate) == io_features * intermediate_feature_factor

    k1, k2, k3, k4 = jax.random.split(key, 4)

    def xavier_normal(k, out_f, in_f):
        std = math.sqrt(2.0 / (in_f + out_f))
        return (std * jax.random.normal(k, (out_f, in_f))).astype(dtype)

    # nn.Linear weight layout: (out_features, in_features)
    w_in = xavier_normal(k1, intermediate, io_features)        # dense_in.weight
    b_in = (0.02 * jax.random.normal(k2, (intermediate,))).astype(dtype)
    w_out = xavier_normal(k3, io_features, intermediate)       # dense_out.weight
    b_out = (0.02 * jax.random.normal(k4, (io_features,))).astype(dtype)
    return w_in, b_in, w_out, b_out


def reference_mlp(x, w_in, b_in, w_out, b_out):
    h = jnp.dot(x, w_in.T) + b_in
    h = jax.nn.gelu(h, approximate=False)
    return jnp.dot(h, w_out.T) + b_out


if __name__ == "__main__":
    # Small, lane-friendly shapes: batch=2, seq=8, hidden=128, factor=4 -> F=512.
    batch, seq, hidden = 2, 8, 128
    factor = 4.0

    key = jax.random.PRNGKey(0)
    k_x, k_p, k_r = jax.random.split(key, 3)
    x = jax.random.normal(k_x, (batch, seq, hidden), dtype=jnp.float32)
    w_in, b_in, w_out, b_out = init_params(k_p, hidden, factor)

    ref = reference_mlp(x, w_in, b_in, w_out, b_out)

    # 1) f32 compute path (test-only; bf16 is the perf default on all gens).
    params_f32 = prepare_mlp_params(w_in, b_in, w_out, b_out,
                                    compute_dtype=jnp.float32)
    out_f32 = jax.block_until_ready(parallel_mlp_forward(x, *params_f32))
    assert out_f32.shape == (batch, seq, hidden)
    assert jnp.allclose(out_f32, ref, atol=2e-3, rtol=2e-3), "f32 path mismatch"

    # 2) bf16 fast path (f32 accumulation); tf=256 exercises the F-reduction.
    params_bf16 = prepare_mlp_params(w_in, b_in, w_out, b_out)
    out_bf16 = jax.block_until_ready(
        parallel_mlp_forward(x, *params_bf16, tf=256))
    assert out_bf16.shape == (batch, seq, hidden)
    assert jnp.allclose(out_bf16, ref, atol=5e-2, rtol=5e-2), "bf16 path mismatch"

    # 3) Ragged token count (M=15): exercises masked partial M blocks
    #    (no pad / slice round-trips) plus the multi-step F reduction.
    xr = jax.random.normal(k_r, (3, 5, hidden), dtype=jnp.float32)
    ref_r = reference_mlp(xr, w_in, b_in, w_out, b_out)
    out_r = jax.block_until_ready(
        parallel_mlp_forward(xr, *params_f32, tf=256))
    assert out_r.shape == (3, 5, hidden)
    assert jnp.allclose(out_r, ref_r, atol=2e-3, rtol=2e-3), "ragged-M mismatch"

    print("KERNEL_OK")
</pallas_src>

<mosaic_0001>
module attributes {stable_mosaic.version = 11 : i64} {
  func.func @_mlp_kernel(%arg0: i32, %arg1: i32, %arg2: memref<8x128xf32, #tpu.memory_space<vmem>>, %arg3: memref<128x512xf32, #tpu.memory_space<vmem>>, %arg4: memref<1x512xf32, #tpu.memory_space<vmem>>, %arg5: memref<512x128xf32, #tpu.memory_space<vmem>>, %arg6: memref<1x128xf32, #tpu.memory_space<vmem>>, %arg7: memref<8x128xf32, #tpu.memory_space<vmem>>, %arg8: memref<8x128xf32, #tpu.memory_space<vmem>>) attributes {dimension_semantics = [#tpu.dimension_semantics<parallel>, #tpu.dimension_semantics<arbitrary>], iteration_bounds = array<i64: 2, 1>, scalar_prefetch = 0 : i64, scratch_operands = 1 : i64, tpu.core_type = #tpu.core_type<tc>, window_params = [{transform_indices = @transform_0, window_bounds = array<i64: 8, 128>}, {transform_indices = @transform_1, window_bounds = array<i64: 128, 512>}, {transform_indices = @transform_2, window_bounds = array<i64: 1, 512>}, {transform_indices = @transform_3, window_bounds = array<i64: 512, 128>}, {pipeline_mode = #tpu.pipeline_mode<synchronous>, transform_indices = @transform_4, window_bounds = array<i64: 1, 128>}, {transform_indices = @transform_5, window_bounds = array<i64: 8, 128>}]} {
    %c0_i32 = arith.constant 0 : i32
    %0 = arith.cmpi eq, %arg1, %c0_i32 : i32
    %1 = arith.extui %0 : i1 to i32
    %c0_i32_0 = arith.constant 0 : i32
    %2 = arith.cmpi ne, %1, %c0_i32_0 : i32
    scf.if %2 {
      %cst_18 = arith.constant 0.000000e+00 : f32
      %25 = vector.broadcast %cst_18 : f32 to vector<8x128xf32>
      %c0_19 = arith.constant 0 : index
      %c0_20 = arith.constant 0 : index
      %26 = vector.load %arg8[%c0_19, %c0_20] : memref<8x128xf32, #tpu.memory_space<vmem>>, vector<8x128xf32>
      tpu.vector_store %arg8[%c0_19, %c0_20], %25 {strides = array<i32>} : memref<8x128xf32, #tpu.memory_space<vmem>>, vector<8x128xf32>,
    } else {
    }
    %c0 = arith.constant 0 : index
    %c0_1 = arith.constant 0 : index
    %3 = vector.load %arg3[%c0, %c0_1] : memref<128x512xf32, #tpu.memory_space<vmem>>, vector<128x512xf32>
    %c0_2 = arith.constant 0 : index
    %c0_3 = arith.constant 0 : index
    %4 = vector.load %arg2[%c0_2, %c0_3] : memref<8x128xf32, #tpu.memory_space<vmem>>, vector<8x128xf32>
    %cst = arith.constant dense<0.000000e+00> : vector<8x512xf32>
    %5 = tpu.matmul %4, %3, %cst {dimension_numbers = #tpu.dot_dimension_numbers<[1], [0], [0], [1], [0, 0, 1, 1], [], []>} : vector<8x128xf32>, vector<128x512xf32>, vector<8x512xf32> -> vector<8x512xf32>
    %c0_4 = arith.constant 0 : index
    %c0_5 = arith.constant 0 : index
    %6 = vector.load %arg4[%c0_4, %c0_5] : memref<1x512xf32, #tpu.memory_space<vmem>>, vector<1x512xf32>
    %7 = vector.broadcast %6 : vector<1x512xf32> to vector<8x512xf32>
    %8 = arith.addf %5, %7 : vector<8x512xf32>
    %cst_6 = arith.constant 5.000000e-01 : f32
    %9 = vector.broadcast %cst_6 : f32 to vector<8x512xf32>
    %10 = arith.mulf %9, %8 : vector<8x512xf32>
    %cst_7 = arith.constant 0.707106769 : f32
    %11 = vector.broadcast %cst_7 : f32 to vector<8x512xf32>
    %12 = arith.mulf %8, %11 : vector<8x512xf32>
    %13 = math.erf %12 : vector<8x512xf32>
    %cst_8 = arith.constant 1.000000e+00 : f32
    %14 = vector.broadcast %cst_8 : f32 to vector<8x512xf32>
    %15 = arith.addf %14, %13 : vector<8x512xf32>
    %16 = arith.mulf %10, %15 : vector<8x512xf32>
    %c0_9 = arith.constant 0 : index
    %c0_10 = arith.constant 0 : index
    %17 = vector.load %arg5[%c0_9, %c0_10] : memref<512x128xf32, #tpu.memory_space<vmem>>, vector<512x128xf32>
    %c0_11 = arith.constant 0 : index
    %c0_12 = arith.constant 0 : index
    %18 = vector.load %arg8[%c0_11, %c0_12] : memref<8x128xf32, #tpu.memory_space<vmem>>, vector<8x128xf32>
    %cst_13 = arith.constant dense<0.000000e+00> : vector<8x128xf32>
    %19 = tpu.matmul %16, %17, %cst_13 {dimension_numbers = #tpu.dot_dimension_numbers<[1], [0], [0], [1], [0, 0, 1, 1], [], []>} : vector<8x512xf32>, vector<512x128xf32>, vector<8x128xf32> -> vector<8x128xf32>
    %20 = arith.addf %18, %19 : vector<8x128xf32>
    %c0_14 = arith.constant 0 : index
    %c0_15 = arith.constant 0 : index
    %21 = vector.load %arg8[%c0_14, %c0_15] : memref<8x128xf32, #tpu.memory_space<vmem>>, vector<8x128xf32>
    tpu.vector_store %arg8[%c0_14, %c0_15], %20 {strides = array<i32>} : memref<8x128xf32, #tpu.memory_space<vmem>>, vector<8x128xf32>,
    %c0_i32_16 = arith.constant 0 : i32
    %22 = arith.cmpi eq, %arg1, %c0_i32_16 : i32
    %23 = arith.extui %22 : i1 to i32
    %c0_i32_17 = arith.constant 0 : i32
    %24 = arith.cmpi ne, %23, %c0_i32_17 : i32
    scf.if %24 {
      %c0_18 = arith.constant 0 : index
      %c0_19 = arith.constant 0 : index
      %25 = vector.load %arg8[%c0_18, %c0_19] : memref<8x128xf32, #tpu.memory_space<vmem>>, vector<8x128xf32>
      %c0_20 = arith.constant 0 : index
      %c0_21 = arith.constant 0 : index
      %26 = vector.load %arg6[%c0_20, %c0_21] : memref<1x128xf32, #tpu.memory_space<vmem>>, vector<1x128xf32>
      %27 = vector.broadcast %26 : vector<1x128xf32> to vector<8x128xf32>
      %28 = arith.addf %25, %27 : vector<8x128xf32>
      %c0_22 = arith.constant 0 : index
      %c0_23 = arith.constant 0 : index
      %29 = vector.load %arg7[%c0_22, %c0_23] : memref<8x128xf32, #tpu.memory_space<vmem>>, vector<8x128xf32>
      tpu.vector_store %arg7[%c0_22, %c0_23], %28 {strides = array<i32>} : memref<8x128xf32, #tpu.memory_space<vmem>>, vector<8x128xf32>,
    } else {
    }
    return
  }
  func.func @transform_0(%arg0: i32, %arg1: i32) -> (i32, i32) {
    %c0_i32 = arith.constant 0 : i32
    %c0_i32_0 = arith.constant 0 : i32
    return %arg0, %c0_i32 : i32, i32
  }
  func.func @transform_1(%arg0: i32, %arg1: i32) -> (i32, i32) {
    %c0_i32 = arith.constant 0 : i32
    %c0_i32_0 = arith.constant 0 : i32
    return %c0_i32, %arg1 : i32, i32
  }
  func.func @transform_2(%arg0: i32, %arg1: i32) -> (i32, i32) {
    %c0_i32 = arith.constant 0 : i32
    %c0_i32_0 = arith.constant 0 : i32
    return %c0_i32, %arg1 : i32, i32
  }
  func.func @transform_3(%arg0: i32, %arg1: i32) -> (i32, i32) {
    %c0_i32 = arith.constant 0 : i32
    %c0_i32_0 = arith.constant 0 : i32
    return %arg1, %c0_i32 : i32, i32
  }
  func.func @transform_4(%arg0: i32, %arg1: i32) -> (i32, i32) {
    %c0_i32 = arith.constant 0 : i32
    %c0_i32_0 = arith.constant 0 : i32
    %c0_i32_1 = arith.constant 0 : i32
    return %c0_i32, %c0_i32_0 : i32, i32
  }
  func.func @transform_5(%arg0: i32, %arg1: i32) -> (i32, i32) {
    %c0_i32 = arith.constant 0 : i32
    %c0_i32_0 = arith.constant 0 : i32
    return %arg0, %c0_i32 : i32, i32
  }
}

</mosaic_0001>

<bundles_post_ra>
// kernel: tpu_custom_call.1
= control target key start
LH: loop header
LB: loop body
LE: loop exit
PB: predicated region body
PF: predicated region fallthrough
CT: control target
= control target key end

     0   :  { %s1550_s0 = inlined_call_operand.hbm [shape: f32[16,128], index: 0, kind: input, shape index: {}]   ;;  %s1551_s1 = inlined_call_operand.hbm [shape: f32[128,512], index: 1, kind: input, shape index: {}]   ;;  %s1552_s2 = inlined_call_operand.hbm [shape: f32[1,512], index: 2, kind: input, shape index: {}]   ;;  %s1553_s3 = inlined_call_operand.hbm [shape: f32[512,128], index: 3, kind: input, shape index: {}]   ;;  %s1554_s4 = inlined_call_operand.vmem [shape: f32[1,128], index: 4, kind: input, shape index: {}]   ;;  %s1555_s5 = inlined_call_operand.hbm [shape: f32[16,128], index: 5, kind: output, shape index: {}]  }
   0x1   :  { %1560 = sst [smem:[#allocation16_spill]] %s1551_s1 }
   0x2   :  { %10 = vsyncpa [#allocation4], 0 }
   0x3   :  { %12 = vsyncpa [#allocation4 + $0x1], 0 }
   0x4   :  { %13 = vsyncpa [#allocation7], 0 }
   0x5   :  { %14 = vsyncpa [#allocation10], 0 }
   0x6   :  { %15 = vsyncpa [#allocation5], 0 }
   0x7   :  { %17 = vsyncpa [#allocation5 + $0x1], 0  ;;  %s1354_s18 = smov 0   ;;  %s1356_s19 = smov 0  }
   0x8   :  { %s1358_s20 = smov 0   ;;  %s1360_s21 = smov 0  }
   0x9   :  { %s1362_s22 = smov 0   ;;  %s1364_s23 = smov 0  }
   0xa LB: > { %s922_s24 = sadd.s32 4294967295, %s1312_s23   ;;  %s923_s25 = sadd.s32 4294967294, %s1312_s23   ;;  %s1312_s23 = sphi %s1364_s23, %s23_s23   ;;  %s1308_s22 = sphi %s1362_s22, %s1579_s22   ;;  %s1304_s21 = sphi %s1360_s21, %s1578_s21   ;;  %s1300_s20 = sphi %s1358_s20, %s1577_s20   ;;  %s1296_s19 = sphi %s1356_s19, %s1576_s19   ;;  %s1292_s18 = sphi %s1354_s18, %s1575_s18  }
   0xb   : > { %p55_p0 = scmp.ne.s32.totalorder %s1296_s19, %s1292_s18  ;;  %p1388_p1 = scmp.eq.s32.totalorder %s922_s24, 0 }
   0xc   : > { %p1392_p2 = scmp.eq.s32.totalorder %s922_s24, 1  ;;  %p184_p3 = scmp.eq.s32.totalorder %s923_s25, 1 }
   0xd   : > { %s1561_s26 = scalar_select %p1388_p1, 1, 0 }
   0xe   : > { %p1398_p4 = por %p1388_p1, %p55_p0  ;;  %p924_p5 = scmp.ge.s32.totalorder %s1312_s23, 1 }
   0xf   : > { %p1403_p6 = por %p184_p3, %p55_p0  ;;  %p191_p7 = scmp.lt.s32.totalorder %s1312_s23, 3 }
  0x10   : > { %s1563_s28 = scalar_select %p1398_p4, 1, 0 }
  0x11   : > { %s1564_s29 = scalar_select %p1403_p6, 1, 0 }
  0x12   : > { %p1408_p8 = pnand %p924_p5, %p191_p7  ;;  %s1314_s6 = smov [#allocation6]  }
  0x13   : > { %s206_s7 = sshll.u32 %s1314_s6, 4  ;;  %s1315_s9 = smov [#allocation8]   ;;  %s207_s7 = int_to_ptr.vmem [resolvable:$true] %s206_s7 }
  0x14   : > { %s1565_s30 = scalar_select %p1408_p8, 1, 0 }
  0x15   : > { %p1028_p9 = pneg %p1408_p8  ;;  %s223_s10 = sshll.u32 %s1315_s9, 4  ;;  %s224_s10 = int_to_ptr.vmem [resolvable:$true] %s223_s10 }
  0x16   : > { %s1316_s11 = smov [#allocation9]   ;;  %s1129_s13 = scalar_lea.vmem %s207_s7, 8192 }
  0x17   : > { %p1417_p11 = pnand %p1028_p9, %p1388_p1  ;;  %s236_s12 = sshll.u32 %s1316_s11, 4  ;;  %s237_s12 = int_to_ptr.vmem [resolvable:$true] %s236_s12 }
  0x18   : > { %p1130_p13 = scmp.ne.s32.totalorder %s207_s7, %s1129_s13  ;;  %p1137_p5 = scmp.lt.s32.totalorder %s207_s7, %s207_s7 }
  0x19   : > { %p1120_p12 = pneg %p1417_p11  ;;  %p1138_p7 = scmp.lt.s32.totalorder %s1129_s13, %s1129_s13 }
  0x1b   : > { %p1132_p0 = pnand %p1130_p13, %p1120_p12  ;;  %p1139_p9 = por %p1138_p7, %p1137_p5 }
  0x1d   : > { %p1133_p3 = pneg %p1132_p0 }
  0x1f   : > { %p1140_p10 = pnand %p1139_p9, %p1133_p3 }
  0x21   : > { %1143 = shalt.err (!%p1140_p10)
}
  0x22   : > { %s1317_s14 = smov 512   ;;  %s1318_s15 = smov 32  }
  0x23   : > { %s1567_s1 = sld [smem:[#allocation16_spill]]  ;;  %s1155_s24 = scalar_lea.vmem %s224_s10, 64 }
  0x24   : > { %p1156_p6 = scmp.ne.s32.totalorder %s224_s10, %s1155_s24  ;;  %p1163_p1 = scmp.lt.s32.totalorder %s224_s10, %s224_s10 }
  0x25   : > { %p1164_p4 = scmp.lt.s32.totalorder %s1155_s24, %s1155_s24 }
  0x26   : > { %p1158_p13 = pnand %p1156_p6, %p1120_p12 }
  0x27   : > { %p1165_p5 = por %p1164_p4, %p1163_p1 }
  0x28   : > { %p1159_p0 = pneg %p1158_p13 }
  0x29   : > { %1031 = dma.hbm_to_vmem [thread:$0]  (!%p1417_p11), %s1567_s1, 8192, %s207_s7, [#allocation7], %s1317_s14, %s1317_s14, %s1318_s15  }
  0x2a   : > { %p1166_p3 = pnand %p1165_p5, %p1159_p0 }
  0x2c   : > { %1169 = shalt.err (!%p1166_p3)
}
  0x2d   : > { %1034 = dma.hbm_to_vmem [thread:$0]  (!%p1417_p11), %s1552_s2, 64, %s224_s10, [#allocation7]  }
  0x2e   : > { %s1181_s7 = scalar_lea.vmem %s237_s12, 8192  ;;  %p1189_p9 = scmp.lt.s32.totalorder %s237_s12, %s237_s12 }
  0x2f   : > { %p1182_p10 = scmp.ne.s32.totalorder %s237_s12, %s1181_s7  ;;  %p1190_p13 = scmp.lt.s32.totalorder %s1181_s7, %s1181_s7 }
  0x31   : > { %p1184_p7 = pnand %p1182_p10, %p1120_p12  ;;  %p1191_p8 = por %p1190_p13, %p1189_p9 }
  0x33   : > { %p1185_p6 = pneg %p1184_p7 }
  0x35   : > { %p1192_p1 = pnand %p1191_p8, %p1185_p6 }
  0x37   : > { %1195 = shalt.err (!%p1192_p1)
}
  0x38   : > { %s1319_s9 = smov 128   ;;  %s1320_s10 = smov 8  }
  0x39   : > { %1037 = dma.hbm_to_vmem [thread:$0]  (!%p1417_p11), %s1553_s3, 8192, %s237_s12, [#allocation10], %s1319_s9, %s1319_s9, %s1320_s10  }
  0x3a   : > { %s42_s14 = sadd.s32 1, %s1300_s20  ;;  %s35_s15 = sadd.s32 1, %s1308_s22 }
  0x3b   : > { %p49_p4 = scmp.ne.s32.totalorder %s1300_s20, %s1296_s19  ;;  %p37_p8 = scmp.ge.s32.totalorder %s35_s15, 2 }
  0x3c   : > { %p50_p12 = scmp.eq.s32.totalorder %s1312_s23, 0  ;;  %p1049_p5 = scmp.lt.s32.totalorder %s1312_s23, 2 }
  0x3d   : > { %p1454_p0 = por %p1392_p2, %p49_p4  ;;  %s1581_s15 = smov (%p37_p8, %s35_s15), 0 }
  0x3e   : > { %p51_p3 = por %p50_p12, %p49_p4  ;;  %s253_s8 = sand.u32 1, %s1300_s20  }
  0x3f   : > { %s39_s17 = ssub.s32 %s1308_s22, %s1581_s15  ;;  %s929_s12 = sshll.u32 %s253_s8, 3 }
  0x40   : > { %p40_p10 = scmp.eq.s32.totalorder %s39_s17, 0  ;;  %s930_s24 = sshll.u32 %s1308_s22, 7 }
  0x41   : > { %s262_s27 = scalar_lea.hbm %s1550_s0, %s930_s24  ;;  %s257_s9 = scalar_lea.vmem [#allocation3], %s929_s12 }
  0x42   : > { %s1466_s25 = scalar_select %p40_p10, %s1300_s20, %s42_s14  }
  0x43   : > { %s264_s10 = sshll.u32 %s257_s9, 4  ;;  %p1473_p2 = pnand %p1049_p5, %p51_p3  ;;  %s265_s10 = int_to_ptr.vmem [resolvable:$true] %s264_s10 }
  0x44   : > { %s254_s13 = scalar_lea.sflag [#allocation4], %s253_s8  ;;  %s1209_s17 = scalar_lea.vmem %s265_s10, 128 }
  0x45   : > { %p1198_p11 = pneg %p1473_p2  ;;  %p1210_p7 = scmp.ne.s32.totalorder %s265_s10, %s1209_s17 }
  0x46   : > { %s1321_s14 = smov [#allocation3]  }
  0x47   : > { %p1212_p6 = pnand %p1210_p7, %p1198_p11  ;;  %s1214_s1 = sshll.u32 %s1321_s14, 4  ;;  %s1215_s1 = int_to_ptr.vmem [resolvable:$false] %s1214_s1 }
  0x48   : > { %s1216_s24 = scalar_lea.vmem %s1215_s1, 256  ;;  %p1217_p13 = scmp.lt.s32.totalorder %s265_s10, %s1215_s1 }
  0x49   : > { %p1213_p9 = pneg %p1212_p6  ;;  %p1218_p1 = scmp.lt.s32.totalorder %s1216_s24, %s1209_s17 }
  0x4b   : > { %p1219_p4 = por %p1218_p1, %p1217_p13 }
  0x4d   : > { %p1220_p8 = pnand %p1219_p4, %p1213_p9 }
  0x4f   : > { %1223 = shalt.err (!%p1220_p8)
}
  0x50   : > { %1041 = dma.hbm_to_vmem [thread:$0]  (!%p1473_p2), %s262_s27, 128, %s265_s10, %s254_s13  }
  0x51   : > { %p1570_p12 = scmp.ne.s32.totalorder %s1565_s30, 0 }
  0x52   : > { %s1484_s8 = sand.u32 (!%p1570_p12), 1, %s1296_s19   ;;  %p1571_p5 = scmp.ne.s32.totalorder (!%p1570_p12), %s1563_s28, 0 }
  0x53   : > { %273 = sbr.rel (%p1570_p12) target bundleno = 561 (0x231), region = 40  ;;  %s932_s12 = sshll.u32 (!%p1570_p12), %s1484_s8, 3 }
  0x54   : > { %s276_s6 = scalar_lea.sflag (!%p1570_p12), [#allocation4], %s1484_s8  ;;  %s1490_s1 = scalar_lea.vmem (!%p1570_p12), [#allocation3], %s932_s12 }
  0x58   : > { %1275 = dma.done.wait (%p1571_p5), %s276_s6, 128  }
  0x59   : > { %1277 = vsyncadd (%p1571_p5), %s276_s6, 4294967168  ;;  %p1572_p3 = scmp.ne.s32.totalorder %s1561_s26, 0 }
  0x5b   : > { %1279 = dma.done.wait (%p1572_p3), [#allocation7], 8256  }
  0x5c   : > { %1281 = vsyncadd (%p1572_p3), [#allocation7], 4294959040 }
  0x5d   : > { %1283 = dma.done.wait (%p1572_p3), [#allocation10], 8192  }
  0x5e   : > { %1285 = vsyncadd (%p1572_p3), [#allocation10], 4294959104  ;;  %v1322_v0 = vmov 0.0   ;;  %v387_v1 = vld [vmem:[#allocation6 + $0x1e8] sm:$0xff]  ;;  %v389_v2 = vld [vmem:[#allocation6 + $0x1f8] sm:$0xff]  ;;  %s939_s30 = sshll.u32 %s1304_s21, 7 }
  0x5f   : > { %477 = vmatprep.mubr.f32.mxu0 %v1322_v0  ;;  %548 = vmatprep.mubr.f32.mxu1 %v1322_v0  ;;  %v386_v3 = vld [vmem:[#allocation6 + $0x1e0] sm:$0xff]  ;;  %v388_v4 = vld [vmem:[#allocation6 + $0x1f0] sm:$0xff]  ;;  %v383_v5 = vld [vmem:[#allocation6 + $0x1c8] sm:$0xff]  ;;  %s317_s7 = scalar_lea.vmem [#allocation11], %s932_s12  ;;  %s807_s11 = scalar_lea.hbm %s1555_s5, %s939_s30 }
  0x60   : > { %413 = vmatprep.subr.mxu0 %v387_v1  ;;  %484 = vmatprep.subr.mxu1 %v389_v2  ;;  %v385_v6 = vld [vmem:[#allocation6 + $0x1d8] sm:$0xff]  ;;  %v382_v7 = vld [vmem:[#allocation6 + $0x1c0] sm:$0xff]  ;;  %v384_v8 = vld [vmem:[#allocation6 + $0x1d0] sm:$0xff]  ;;  %s809_s27 = sshll.u32 %s317_s7, 4  ;;  %s796_s13 = scalar_lea.sflag [#allocation5], %s1484_s8  ;;  %s810_s27 = int_to_ptr.vmem [resolvable:$true] %s809_s27 }
  0x61   : > { %414 = vmatpush1.msra.mxu0 %v386_v3  ;;  %485 = vmatpush1.msra.mxu1 %v388_v4  ;;  %v379_v9 = vld [vmem:[#allocation6 + $0x1a8] sm:$0xff]  ;;  %v381_v10 = vld [vmem:[#allocation6 + $0x1b8] sm:$0xff]  ;;  %v378_v11 = vld [vmem:[#allocation6 + $0x1a0] sm:$0xff]  ;;  %s1224_s17 = scalar_lea.vmem %s810_s27, 128  ;;  %s1323_s14 = smov [#allocation11]  }
  0x62   : > { %415 = vmatprep.subr.mxu0 %v383_v5  ;;  %486 = vmatprep.subr.mxu1 %v385_v6  ;;  %v380_v12 = vld [vmem:[#allocation6 + $0x1b0] sm:$0xff]  ;;  %v375_v13 = vld [vmem:[#allocation6 + $0x188] sm:$0xff]  ;;  %v377_v14 = vld [vmem:[#allocation6 + $0x198] sm:$0xff]  ;;  %p1225_p10 = scmp.ne.s32.totalorder %s810_s27, %s1224_s17  ;;  %s1228_s24 = sshll.u32 %s1323_s14, 4  ;;  %s1229_s24 = int_to_ptr.vmem [resolvable:$false] %s1228_s24 }
  0x63   : > { %416 = vmatpush1.msra.mxu0 %v382_v7  ;;  %487 = vmatpush1.msra.mxu1 %v384_v8  ;;  %v374_v15 = vld [vmem:[#allocation6 + $0x180] sm:$0xff]  ;;  %v376_v16 = vld [vmem:[#allocation6 + $0x190] sm:$0xff]  ;;  %v371_v17 = vld [vmem:[#allocation6 + $0x168] sm:$0xff]  ;;  %s1230_s21 = scalar_lea.vmem %s1229_s24, 256  ;;  %p1231_p7 = scmp.lt.s32.totalorder %s810_s27, %s1229_s24 }
  0x64   : > { %417 = vmatprep.subr.mxu0 %v379_v9  ;;  %488 = vmatprep.subr.mxu1 %v381_v10  ;;  %v373_v18 = vld [vmem:[#allocation6 + $0x178] sm:$0xff]  ;;  %v370_v19 = vld [vmem:[#allocation6 + $0x160] sm:$0xff]  ;;  %v372_v20 = vld [vmem:[#allocation6 + $0x170] sm:$0xff]  ;;  %p1226_p2 = pnand %p1225_p10, %p1454_p0  ;;  %p1232_p6 = scmp.lt.s32.totalorder %s1230_s21, %s1224_s17 }
  0x65   : > { %418 = vmatpush1.msra.mxu0 %v378_v11  ;;  %489 = vmatpush1.msra.mxu1 %v380_v12  ;;  %v367_v21 = vld [vmem:[#allocation6 + $0x148] sm:$0xff]  ;;  %v369_v22 = vld [vmem:[#allocation6 + $0x158] sm:$0xff]  ;;  %v366_v23 = vld [vmem:[#allocation6 + $0x140] sm:$0xff] }
  0x66   : > { %419 = vmatprep.subr.mxu0 %v375_v13  ;;  %490 = vmatprep.subr.mxu1 %v377_v14  ;;  %v368_v24 = vld [vmem:[#allocation6 + $0x150] sm:$0xff]  ;;  %v363_v25 = vld [vmem:[#allocation6 + $0x128] sm:$0xff]  ;;  %v365_v26 = vld [vmem:[#allocation6 + $0x138] sm:$0xff]  ;;  %p1227_p11 = pneg %p1226_p2  ;;  %p1233_p9 = por %p1232_p6, %p1231_p7 }
  0x67   : > { %420 = vmatpush1.msra.mxu0 %v374_v15  ;;  %491 = vmatpush1.msra.mxu1 %v376_v16  ;;  %v362_v27 = vld [vmem:[#allocation6 + $0x120] sm:$0xff]  ;;  %v364_v28 = vld [vmem:[#allocation6 + $0x130] sm:$0xff]  ;;  %v359_v29 = vld [vmem:[#allocation6 + $0x108] sm:$0xff] }
  0x68   : > { %421 = vmatprep.subr.mxu0 %v371_v17  ;;  %492 = vmatprep.subr.mxu1 %v373_v18  ;;  %v361_v30 = vld [vmem:[#allocation6 + $0x118] sm:$0xff]  ;;  %v358_v31 = vld [vmem:[#allocation6 + $0x100] sm:$0xff]  ;;  %v360_v32 = vld [vmem:[#allocation6 + $0x110] sm:$0xff]  ;;  %p1234_p13 = pnand %p1233_p9, %p1227_p11 }
  0x69   : > { %422 = vmatpush1.msra.mxu0 %v370_v19  ;;  %493 = vmatpush1.msra.mxu1 %v372_v20  ;;  %v355_v33 = vld [vmem:[#allocation6 + $0xe8] sm:$0xff]  ;;  %v357_v34 = vld [vmem:[#allocation6 + $0xf8] sm:$0xff]  ;;  %v354_v35 = vld [vmem:[#allocation6 + $0xe0] sm:$0xff] }
  0x6a   : > { %423 = vmatprep.subr.mxu0 %v367_v21  ;;  %494 = vmatprep.subr.mxu1 %v369_v22  ;;  %v356_v36 = vld [vmem:[#allocation6 + $0xf0] sm:$0xff]  ;;  %v351_v37 = vld [vmem:[#allocation6 + $0xc8] sm:$0xff]  ;;  %v353_v38 = vld [vmem:[#allocation6 + $0xd8] sm:$0xff] }
  0x6b   : > { %424 = vmatpush1.msra.mxu0 %v366_v23  ;;  %495 = vmatpush1.msra.mxu1 %v368_v24  ;;  %v350_v39 = vld [vmem:[#allocation6 + $0xc0] sm:$0xff]  ;;  %v352_v40 = vld [vmem:[#allocation6 + $0xd0] sm:$0xff]  ;;  %v347_v41 = vld [vmem:[#allocation6 + $0xa8] sm:$0xff] }
  0x6c   : > { %425 = vmatprep.subr.mxu0 %v363_v25  ;;  %496 = vmatprep.subr.mxu1 %v365_v26  ;;  %v349_v42 = vld [vmem:[#allocation6 + $0xb8] sm:$0xff]  ;;  %v346_v43 = vld [vmem:[#allocation6 + $0xa0] sm:$0xff]  ;;  %v348_v44 = vld [vmem:[#allocation6 + $0xb0] sm:$0xff] }
  0x6d   : > { %426 = vmatpush1.msra.mxu0 %v362_v27  ;;  %497 = vmatpush1.msra.mxu1 %v364_v28  ;;  %v343_v45 = vld [vmem:[#allocation6 + $0x88] sm:$0xff]  ;;  %v345_v46 = vld [vmem:[#allocation6 + $0x98] sm:$0xff]  ;;  %v342_v47 = vld [vmem:[#allocation6 + $0x80] sm:$0xff] }
  0x6e   : > { %427 = vmatprep.subr.mxu0 %v359_v29  ;;  %498 = vmatprep.subr.mxu1 %v361_v30  ;;  %v344_v48 = vld [vmem:[#allocation6 + $0x90] sm:$0xff]  ;;  %v339_v49 = vld [vmem:[#allocation6 + $0x68] sm:$0xff]  ;;  %v341_v50 = vld [vmem:[#allocation6 + $0x78] sm:$0xff] }
  0x6f   : > { %428 = vmatpush1.msra.mxu0 %v358_v31  ;;  %499 = vmatpush1.msra.mxu1 %v360_v32  ;;  %v338_v51 = vld [vmem:[#allocation6 + $0x60] sm:$0xff]  ;;  %v340_v52 = vld [vmem:[#allocation6 + $0x70] sm:$0xff]  ;;  %v335_v53 = vld [vmem:[#allocation6 + $0x48] sm:$0xff] }
  0x70   : > { %429 = vmatprep.subr.mxu0 %v355_v33  ;;  %500 = vmatprep.subr.mxu1 %v357_v34  ;;  %v337_v54 = vld [vmem:[#allocation6 + $0x58] sm:$0xff]  ;;  %v334_v55 = vld [vmem:[#allocation6 + $0x40] sm:$0xff]  ;;  %v336_v56 = vld [vmem:[#allocation6 + $0x50] sm:$0xff] }
  0x71   : > { %430 = vmatpush1.msra.mxu0 %v354_v35  ;;  %501 = vmatpush1.msra.mxu1 %v356_v36  ;;  %v331_v57 = vld [vmem:[#allocation6 + $0x28] sm:$0xff]  ;;  %v333_v58 = vld [vmem:[#allocation6 + $0x38] sm:$0xff]  ;;  %v330_v59 = vld [vmem:[#allocation6 + $0x20] sm:$0xff] }
  0x72   : > { %431 = vmatprep.subr.mxu0 %v351_v37  ;;  %502 = vmatprep.subr.mxu1 %v353_v38  ;;  %v332_v60 = vld [vmem:[#allocation6 + $0x30] sm:$0xff]  ;;  %v327_v61 = vld [vmem:[#allocation6 + $0x8] sm:$0xff]  ;;  %v329_v62 = vld [vmem:[#allocation6 + $0x18] sm:$0xff] }
  0x73   : > { %432 = vmatpush1.msra.mxu0 %v350_v39  ;;  %503 = vmatpush1.msra.mxu1 %v352_v40  ;;  %v326_v63 = vld [vmem:[#allocation6] sm:$0xff]  ;;  %v328_v0 = vld [vmem:[#allocation6 + $0x10] sm:$0xff] }
  0x74   : > { %433 = vmatprep.subr.mxu0 %v347_v41  ;;  %504 = vmatprep.subr.mxu1 %v349_v42  ;;  %v390_v1 = vld [vmem:[%s1490_s1] sm:$0xff]  ;;  %v603_v14 = vld [vmem:[#allocation9 + $0xe0] sm:$0xff] }
  0x75   : > { %434 = vmatpush1.msra.mxu0 %v346_v43  ;;  %505 = vmatpush1.msra.mxu1 %v348_v44  ;;  %v606_v2 = vld [vmem:[#allocation9 + $0xf8] sm:$0xff]  ;;  %v605_v6 = vld [vmem:[#allocation9 + $0xf0] sm:$0xff]  ;;  %v604_v10 = vld [vmem:[#allocation9 + $0xe8] sm:$0xff] }
  0x76   : > { %435 = vmatprep.subr.mxu0 %v343_v45  ;;  %506 = vmatprep.subr.mxu1 %v345_v46  ;;  %v638_v3 = vld [vmem:[#allocation9 + $0x1f8] sm:$0xff]  ;;  %v637_v7 = vld [vmem:[#allocation9 + $0x1f0] sm:$0xff]  ;;  %v636_v11 = vld [vmem:[#allocation9 + $0x1e8] sm:$0xff] }
  0x77   : > { %436 = vmatpush1.msra.mxu0 %v342_v47  ;;  %507 = vmatpush1.msra.mxu1 %v344_v48  ;;  %v590_v4 = vld [vmem:[#allocation9 + $0x78] sm:$0xff]  ;;  %v589_v8 = vld [vmem:[#allocation9 + $0x70] sm:$0xff]  ;;  %v588_v12 = vld [vmem:[#allocation9 + $0x68] sm:$0xff] }
  0x78   : > { %437 = vmatprep.subr.mxu0 %v339_v49  ;;  %508 = vmatprep.subr.mxu1 %v341_v50  ;;  %v622_v5 = vld [vmem:[#allocation9 + $0x178] sm:$0xff]  ;;  %v621_v9 = vld [vmem:[#allocation9 + $0x170] sm:$0xff]  ;;  %v620_v13 = vld [vmem:[#allocation9 + $0x168] sm:$0xff] }
  0x79   : > { %438 = vmatpush1.msra.mxu0 %v338_v51  ;;  %509 = vmatpush1.msra.mxu1 %v340_v52  ;;  %v635_v15 = vld [vmem:[#allocation9 + $0x1e0] sm:$0xff]  ;;  %v602_v18 = vld [vmem:[#allocation9 + $0xd8] sm:$0xff]  ;;  %v601_v22 = vld [vmem:[#allocation9 + $0xd0] sm:$0xff] }
  0x7a   : > { %439 = vmatprep.subr.mxu0 %v335_v53  ;;  %510 = vmatprep.subr.mxu1 %v337_v54  ;;  %v587_v16 = vld [vmem:[#allocation9 + $0x60] sm:$0xff]  ;;  %v634_v19 = vld [vmem:[#allocation9 + $0x1d8] sm:$0xff]  ;;  %v633_v23 = vld [vmem:[#allocation9 + $0x1d0] sm:$0xff] }
  0x7b   : > { %440 = vmatpush1.msra.mxu0 %v334_v55  ;;  %511 = vmatpush1.msra.mxu1 %v336_v56  ;;  %v619_v17 = vld [vmem:[#allocation9 + $0x160] sm:$0xff]  ;;  %v586_v20 = vld [vmem:[#allocation9 + $0x58] sm:$0xff]  ;;  %v585_v24 = vld [vmem:[#allocation9 + $0x50] sm:$0xff] }
  0x7c   : > { %441 = vmatprep.subr.mxu0 %v331_v57  ;;  %512 = vmatprep.subr.mxu1 %v333_v58  ;;  %v618_v21 = vld [vmem:[#allocation9 + $0x158] sm:$0xff]  ;;  %v617_v25 = vld [vmem:[#allocation9 + $0x150] sm:$0xff]  ;;  %v600_v26 = vld [vmem:[#allocation9 + $0xc8] sm:$0xff] }
  0x7d   : > { %442 = vmatpush1.msra.mxu0 %v330_v59  ;;  %513 = vmatpush1.msra.mxu1 %v332_v60  ;;  %v632_v27 = vld [vmem:[#allocation9 + $0x1c8] sm:$0xff]  ;;  %v599_v30 = vld [vmem:[#allocation9 + $0xc0] sm:$0xff]  ;;  %v598_v34 = vld [vmem:[#allocation9 + $0xb8] sm:$0xff] }
  0x7e   : > { %443 = vmatprep.subr.mxu0 %v327_v61  ;;  %514 = vmatprep.subr.mxu1 %v329_v62  ;;  %v584_v28 = vld [vmem:[#allocation9 + $0x48] sm:$0xff]  ;;  %v631_v31 = vld [vmem:[#allocation9 + $0x1c0] sm:$0xff]  ;;  %v630_v35 = vld [vmem:[#allocation9 + $0x1b8] sm:$0xff] }
  0x7f   : > { %444 = vmatpush1.msra.mxu0 %v326_v63  ;;  %515 = vmatpush1.msra.mxu1 %v328_v0  ;;  %v616_v29 = vld [vmem:[#allocation9 + $0x148] sm:$0xff]  ;;  %v583_v32 = vld [vmem:[#allocation9 + $0x40] sm:$0xff]  ;;  %v582_v36 = vld [vmem:[#allocation9 + $0x38] sm:$0xff] }
  0x80   : > { %478 = vmatmul.mubr.f32.vlgmr.msra.gmra.mxu0 %v390_v1  ;;  %549 = vmatmul.mubr.f32.vlgmr.msra.gmra.mxu1 %v390_v1  ;;  %v615_v33 = vld [vmem:[#allocation9 + $0x140] sm:$0xff]  ;;  %v614_v37 = vld [vmem:[#allocation9 + $0x138] sm:$0xff]  ;;  %v597_v38 = vld [vmem:[#allocation9 + $0xb0] sm:$0xff] }
  0x81   : > { %942 = vmatprep.subr.mxu0 %v606_v2  ;;  %977 = vmatprep.subr.mxu1 %v638_v3  ;;  %v629_v39 = vld [vmem:[#allocation9 + $0x1b0] sm:$0xff]  ;;  %v596_v42 = vld [vmem:[#allocation9 + $0xa8] sm:$0xff]  ;;  %v595_v46 = vld [vmem:[#allocation9 + $0xa0] sm:$0xff]  ;;  %v393_v2 = vlaneseq }
  0x82   : > { %943 = vmatpush3.msra.mxu0 %v590_v4  ;;  %978 = vmatpush3.msra.mxu1 %v622_v5  ;;  %v581_v40 = vld [vmem:[#allocation9 + $0x30] sm:$0xff]  ;;  %v628_v43 = vld [vmem:[#allocation9 + $0x1a8] sm:$0xff]  ;;  %v627_v47 = vld [vmem:[#allocation9 + $0x1a0] sm:$0xff] }
  0x83   : > { %944 = vmatprep.subr.mxu0 %v605_v6  ;;  %979 = vmatprep.subr.mxu1 %v637_v7  ;;  %v613_v41 = vld [vmem:[#allocation9 + $0x130] sm:$0xff]  ;;  %v580_v44 = vld [vmem:[#allocation9 + $0x28] sm:$0xff]  ;;  %v579_v48 = vld [vmem:[#allocation9 + $0x20] sm:$0xff]  ;;  %v394_v3 = vshrl.u32 %v393_v2, 7 }
  0x84   : > { %945 = vmatpush3.msra.mxu0 %v589_v8  ;;  %980 = vmatpush3.msra.mxu1 %v621_v9  ;;  %v612_v45 = vld [vmem:[#allocation9 + $0x128] sm:$0xff]  ;;  %v611_v49 = vld [vmem:[#allocation9 + $0x120] sm:$0xff]  ;;  %v594_v50 = vld [vmem:[#allocation9 + $0x98] sm:$0xff] }
  0x85   : > { %946 = vmatprep.subr.mxu0 %v604_v10  ;;  %981 = vmatprep.subr.mxu1 %v636_v11  ;;  %v626_v51 = vld [vmem:[#allocation9 + $0x198] sm:$0xff]  ;;  %v593_v54 = vld [vmem:[#allocation9 + $0x90] sm:$0xff]  ;;  %v592_v58 = vld [vmem:[#allocation9 + $0x88] sm:$0xff]  ;;  %v395_v4 = vsub.s32 0, %v394_v3  ;;  %v403_v5 = vsub.s32 2, %v394_v3  ;;  %v399_v7 = vsub.s32 1, %v394_v3 }
  0x86   : > { %947 = vmatpush3.msra.mxu0 %v588_v12  ;;  %982 = vmatpush3.msra.mxu1 %v620_v13  ;;  %v578_v52 = vld [vmem:[#allocation9 + $0x18] sm:$0xff]  ;;  %v625_v55 = vld [vmem:[#allocation9 + $0x190] sm:$0xff]  ;;  %v624_v59 = vld [vmem:[#allocation9 + $0x188] sm:$0xff]  ;;  %v407_v8 = vsub.s32 3, %v394_v3 }
  0x87   : > { %948 = vmatprep.subr.mxu0 %v603_v14  ;;  %983 = vmatprep.subr.mxu1 %v635_v15  ;;  %v610_v53 = vld [vmem:[#allocation9 + $0x118] sm:$0xff]  ;;  %v577_v56 = vld [vmem:[#allocation9 + $0x10] sm:$0xff]  ;;  %v576_v60 = vld [vmem:[#allocation9 + $0x8] sm:$0xff] }
  0x88   : > { %949 = vmatpush3.msra.mxu0 %v587_v16  ;;  %984 = vmatpush3.msra.mxu1 %v619_v17  ;;  %v609_v57 = vld [vmem:[#allocation9 + $0x110] sm:$0xff]  ;;  %v608_v61 = vld [vmem:[#allocation9 + $0x108] sm:$0xff]  ;;  %v591_v62 = vld [vmem:[#allocation9 + $0x80] sm:$0xff] }
  0x89   : > { %950 = vmatprep.subr.mxu0 %v602_v18  ;;  %985 = vmatprep.subr.mxu1 %v634_v19  ;;  %v623_v63 = vld [vmem:[#allocation9 + $0x180] sm:$0xff]  ;;  %v391_v6 = vld [vmem:[#allocation8] sm:$0xf] }
  0x8a   : > { %951 = vmatpush3.msra.mxu0 %v586_v20  ;;  %986 = vmatpush3.msra.mxu1 %v618_v21  ;;  %v575_v0 = vld [vmem:[#allocation9] sm:$0xff]  ;;  %v396_v9 = vrot.slane %v391_v6, %v395_v4  ;;  %v404_v10 = vrot.slane %v391_v6, %v403_v5  ;;  %v400_v13 = vrot.slane %v391_v6, %v399_v7 }
  0x8b   : > { %952 = vmatprep.subr.mxu0 %v601_v22  ;;  %987 = vmatprep.subr.mxu1 %v633_v23  ;;  %v607_v1 = vld [vmem:[#allocation9 + $0x100] sm:$0xff]  ;;  %v408_v14 = vrot.slane %v391_v6, %v407_v8 }
  0x8c   : > { %953 = vmatpush3.msra.mxu0 %v585_v24  ;;  %988 = vmatpush3.msra.mxu1 %v617_v25 }
  0x8d   : > { %954 = vmatprep.subr.mxu0 %v600_v26  ;;  %989 = vmatprep.subr.mxu1 %v632_v27 }
  0x8e   : > { %955 = vmatpush3.msra.mxu0 %v584_v28  ;;  %990 = vmatpush3.msra.mxu1 %v616_v29 }
  0x8f   : > { %956 = vmatprep.subr.mxu0 %v599_v30  ;;  %991 = vmatprep.subr.mxu1 %v631_v31 }
  0x90   : > { %957 = vmatpush3.msra.mxu0 %v583_v32  ;;  %992 = vmatpush3.msra.mxu1 %v615_v33 }
  0x91   : > { %958 = vmatprep.subr.mxu0 %v598_v34  ;;  %993 = vmatprep.subr.mxu1 %v630_v35 }
  0x92   : > { %959 = vmatpush3.msra.mxu0 %v582_v36  ;;  %994 = vmatpush3.msra.mxu1 %v614_v37 }
  0x93   : > { %960 = vmatprep.subr.mxu0 %v597_v38  ;;  %995 = vmatprep.subr.mxu1 %v629_v39 }
  0x94   : > { %961 = vmatpush3.msra.mxu0 %v581_v40  ;;  %996 = vmatpush3.msra.mxu1 %v613_v41 }
  0x95   : > { %962 = vmatprep.subr.mxu0 %v596_v42  ;;  %997 = vmatprep.subr.mxu1 %v628_v43 }
  0x96   : > { %963 = vmatpush3.msra.mxu0 %v580_v44  ;;  %998 = vmatpush3.msra.mxu1 %v612_v45 }
  0x97   : > { %964 = vmatprep.subr.mxu0 %v595_v46  ;;  %999 = vmatprep.subr.mxu1 %v627_v47  ;;  %v937_v47 = vld [vmem:[%s1554_s4] ss:$0 sm:$0xff] }
  0x98   : > { %965 = vmatpush3.msra.mxu0 %v579_v48  ;;  %1000 = vmatpush3.msra.mxu1 %v611_v49 }
  0x99   : > { %966 = vmatprep.subr.mxu0 %v594_v50  ;;  %1001 = vmatprep.subr.mxu1 %v626_v51 }
  0x9a   : > { %967 = vmatpush3.msra.mxu0 %v578_v52  ;;  %1002 = vmatpush3.msra.mxu1 %v610_v53 }
  0x9b   : > { %968 = vmatprep.subr.mxu0 %v593_v54  ;;  %1003 = vmatprep.subr.mxu1 %v625_v55 }
  0x9c   : > { %969 = vmatpush3.msra.mxu0 %v577_v56  ;;  %1004 = vmatpush3.msra.mxu1 %v609_v57 }
  0x9d   : > { %970 = vmatprep.subr.mxu0 %v592_v58  ;;  %1005 = vmatprep.subr.mxu1 %v624_v59 }
  0x9e   : > { %971 = vmatpush3.msra.mxu0 %v576_v60  ;;  %1006 = vmatpush3.msra.mxu1 %v608_v61 }
  0x9f   : > { %972 = vmatprep.subr.mxu0 %v591_v62  ;;  %1007 = vmatprep.subr.mxu1 %v623_v63 }
  0xa0   : > { %973 = vmatpush3.msra.mxu0 %v575_v0  ;;  %1008 = vmatpush3.msra.mxu1 %v607_v1 }
 0x140   : > { %v479_v11 = vpop.f32.mrf.mxu0  ;;  %v550_v12 = vpop.f32.mrf.mxu1 }
 0x141   : > { %v480_v15 = vadd.f32 %v479_v11, %v396_v9  ;;  %v551_v16 = vadd.f32 %v550_v12, %v404_v10 }
 0x142   : > { %v481_v17 = vpop.f32.mrf.mxu0  ;;  %v552_v18 = vpop.f32.mrf.mxu1 }
 0x143   : > { %v559_v19 = vmul.f32 0.70710677, %v480_v15  ;;  %v561_v20 = vmul.f32 0.70710677, %v551_v16  ;;  %v482_v21 = vadd.f32 %v481_v17, %v400_v13  ;;  %v553_v22 = vadd.f32 %v552_v18, %v408_v14 }
 0x144   : > { %v555_v33 = vmul.f32 0.5, %v480_v15  ;;  %v557_v36 = vmul.f32 0.5, %v551_v16 }
 0x145   : > { %1110 = verf.f32 %v559_v19  ;;  %v560_v23 = vmul.f32 0.70710677, %v482_v21  ;;  %v562_v24 = vmul.f32 0.70710677, %v553_v22  ;;  %v556_v31 = vmul.f32 0.5, %v482_v21 }
 0x146   : > { %1112 = verf.f32 %v561_v20  ;;  %v558_v34 = vmul.f32 0.5, %v553_v22 }
 0x147   : > { %1114 = verf.f32 %v560_v23 }
 0x148   : > { %1116 = verf.f32 %v562_v24 }
 0x152   : > { %v1111_v25 = vpop.eup %1110 }
 0x153   : > { %v1113_v26 = vpop.eup %1112  ;;  %v567_v28 = vadd.f32 1.0, %v1111_v25 }
 0x154   : > { %v1115_v27 = vpop.eup %1114  ;;  %v569_v30 = vadd.f32 1.0, %v1113_v26 }
 0x155   : > { %v1117_v29 = vpop.eup %1116  ;;  %v568_v32 = vadd.f32 1.0, %v1115_v27  ;;  %v571_v38 = vmul.f32 %v567_v28, %v555_v33 }
 0x156   : > { %v570_v35 = vadd.f32 1.0, %v1117_v29  ;;  %v573_v40 = vmul.f32 %v569_v30, %v557_v36 }
 0x157   : > { %v572_v37 = vmul.f32 %v568_v32, %v556_v31 }
 0x158   : > { %v574_v39 = vmul.f32 %v570_v35, %v558_v34 }
 0x159   : > { %704 = vmatprep.mubr.f32.mxu0 %v572_v37 }
 0x15a   : > { %774 = vmatprep.mubr.f32.mxu1 %v574_v39  ;;  %705 = vmatmul.mubr.f32.vlgmr.msra.gmra.mxu0 %v571_v38 }
 0x15b   : > { %775 = vmatmul.mubr.f32.vlgmr.msra.gmra.mxu1 %v573_v40 }
 0x21a   : > { %v974_v41 = vpop.f32.mrf.mxu0 }
 0x21b   : > { %v1009_v42 = vpop.f32.mrf.mxu1 }
 0x21c   : > { %v975_v43 = vpop.f32.mrf.mxu0 }
 0x21d   : > { %v976_v44 = vadd.f32 %v975_v43, %v974_v41  ;;  %v1010_v45 = vpop.f32.mrf.mxu1 }
 0x21e   : > { %v1011_v46 = vadd.f32 %v1010_v45, %v1009_v42 }
 0x220   : > { %v777_v48 = vadd.f32 %v1011_v46, %v976_v44 }
 0x222   : > { %v793_v49 = vadd.f32 %v937_v47, %v777_v48 }
 0x224   : > { %794 = vst [vmem:[%s317_s7] sm:$0xff] %v793_v49 }
 0x225   : > { %1237 = shalt.err (!%p1234_p13)
}
 0x226   : > { %s1238_s12 = scalar_lea.hbm %s807_s11, 128  ;;  %s1242_s1 = scalar_lea.hbm %s1555_s5, 256 }
 0x227   : > { %p1239_p1 = scmp.ne.s32.totalorder %s807_s11, %s1238_s12  ;;  %p1243_p12 = scmp.lt.s32.totalorder %s807_s11, %s1555_s5 }
 0x228   : > { %p1244_p5 = scmp.lt.s32.totalorder %s1242_s1, %s1238_s12 }
 0x229   : > { %p1240_p4 = pnand %p1239_p1, %p1454_p0 }
 0x22a   : > { %p1245_p3 = por %p1244_p5, %p1243_p12 }
 0x22b   : > { %p1241_p8 = pneg %p1240_p4 }
 0x22d   : > { %p1246_p10 = pnand %p1245_p3, %p1241_p8 }
 0x22f   : > { %1249 = shalt.err (!%p1246_p10)
}
 0x230   : > { %1026 = dma.vmem_to_hbm [thread:$0]  (%p1454_p0), %s810_s27, 128, %s807_s11, %s796_s13  }
 0x231 PF: > { %s821_s30 = sand.u32 1, %s1292_s18   ;;  %p1573_p2 = scmp.ne.s32.totalorder %s1564_s29, 0 }
 0x232   : > { %p1574_p11 = scmp.ge.s32.totalorder %s1312_s23, 2  ;;  %s822_s7 = scalar_lea.sflag [#allocation5], %s821_s30 }
 0x234   : > { %p1043_p7 = pnand %p1574_p11, %p1573_p2 }
 0x236   : > { %p1044_p6 = pneg %p1043_p7 }
 0x238   : > { %1287 = dma.done.wait (%p1044_p6), %s822_s7, 128  }
 0x239   : > { %1289 = vsyncadd (%p1044_p6), %s822_s7, 4294967168  ;;  %s23_s23 = sadd.s32 1, %s1312_s23   ;;  %s1575_s18 = smov %s1296_s19 }
 0x23a   : > { %p20_p9 = scmp.ge.s32.totalorder %s23_s23, 4   ;;  %s1576_s19 = smov %s1300_s20 }
 0x23b   : > { %s1577_s20 = smov %s1466_s25  ;;  %s1578_s21 = smov %s1308_s22 }
 0x23c   : > { %s1579_s22 = smov %s1581_s15  ;;  %22 = sbr.rel (!%p20_p9) target bundleno = 10 (0xa), region = 108 }
 0x241   :  { %827 = vsyncpa [#allocation4], 1 }
 0x242   :  { %829 = vsyncpa [#allocation4 + $0x1], 1 }
 0x243   :  { %830 = vsyncpa [#allocation7], 1 }
 0x244   :  { %831 = vsyncpa [#allocation10], 1 }
 0x245   :  { %832 = vsyncpa [#allocation5], 1 }
 0x246   :  { %834 = vsyncpa [#allocation5 + $0x1], 1 }

</bundles_post_ra>
